<compile_context>
chip_gen: v7x
topology: tpu7x:2x2x1
jax: 0.10.0
libtpu: 0.0.40
codegen_flags: <defaults>
</compile_context>

<pallas_src>
import functools

import jax
import jax.numpy as jnp
from jax.experimental import pallas as pl
from jax.experimental.pallas import tpu as pltpu


def _dense_block_kernel(x_ref, halo_ref, w0_ref, w1_ref, b_ref, out_ref, *, d):
    """One (batch row, L-tile) grid step of DenseBlock in NCW layout.

    x_ref    : (1, Cin, TL)      input tile (time on the lane axis)
    halo_ref : (1, Cin, HD)      tail of the *previous* L tile (HD >= d);
                                 contents are ignored (masked) when j == 0
    w0_ref   : (2*Fp, Cin)       tap-0 weights (hit x[t-d]); rows [0:Fp]=filter, [Fp:2Fp]=gate
    w1_ref   : (2*Fp, Cin)       tap-1 weights (hit x[t])
    b_ref    : (2*Fp, 1)         fused biases
    out_ref  : (1, Cin+F, TL)    fused output: [x ; tanh(xf)*sigmoid(xg)]
    """
    j = pl.program_id(1)
    x = x_ref[0]                               # (Cin, TL)
    halo = halo_ref[0]                         # (Cin, HD)
    cin, tl = x.shape
    hd = halo.shape[1]
    f_pad = w0_ref.shape[0] // 2
    f = out_ref.shape[1] - cin

    # Causally shifted copy xs[:, t] = x_global[:, t - d], built in vregs:
    # first d lanes come from the previous tile's tail (zeros for the very
    # first tile), the rest from this tile shifted right by d.
    tail = halo[:, hd - d:]                                   # (Cin, d)
    tail = jnp.where(j > 0, tail, jnp.zeros_like(tail))       # causal zero padding
    xs = jnp.concatenate([tail, x[:, : tl - d]], axis=1)      # (Cin, TL)

    # Filter + gate branches fused (rows stacked) -> one matmul per conv tap.
    y = (jnp.dot(w0_ref[...], xs, preferred_element_type=jnp.float32)
         + jnp.dot(w1_ref[...], x, preferred_element_type=jnp.float32)
         + b_ref[...])                                        # (2*Fp, TL)
    yf = y[:f, :]
    yg = y[f_pad:f_pad + f, :]
    # sigmoid(z) = 0.5*(1 + tanh(z/2)): one transcendental instead of exp+div.
    act = jnp.tanh(yf) * (0.5 + 0.5 * jnp.tanh(0.5 * yg))     # (F, TL)

    # Fused output: identity channels + activations in one lane-dense block.
    out_ref[0, :cin, :] = x.astype(out_ref.dtype)
    out_ref[0, cin:, :] = act.astype(out_ref.dtype)


def _round_up(v, m):
    return -(-v // m) * m


def _pick_tile_l(length, cin, cout, max_tile_l=None):
    """Largest L tile that divides `length`, is a multiple of 128 and fits a
    conservative per-step VMEM byte budget; falls back to the full length."""
    if max_tile_l is None:
        bytes_per_lane = 4 * (3 * cin + 3 * cout)      # dbl-buffered in/out + temps
        budget = 12 << 20
        max_tile_l = max(128, (budget // bytes_per_lane) // 128 * 128)
    best = None
    t = 128
    limit = min(length, max_tile_l)
    while t <= limit:
        if length % t == 0:
            best = t
        t += 128
    # TODO(synk): pad L in the wrapper for long sequences with no 128-multiple
    # divisor instead of falling back to one full-length tile.
    return best if best is not None else length


def _pick_halo(tile_l, d, n_tiles):
    """Smallest 128-multiple halo width >= d that divides tile_l."""
    if n_tiles == 1:
        return tile_l
    c = 128
    while c <= tile_l:
        if c >= d and tile_l % c == 0:
            return c
        c += 128
    return tile_l


def dense_block(x_ncl, wf, bf, wg, bg, dilation, *, max_tile_l=None):
    """DenseBlock forward.

    x_ncl : (N, Cin, L)   -- PyTorch NCW layout
    wf,wg : (F, Cin, K=2) -- PyTorch Conv1d weight layout
    bf,bg : (F,)
    Returns (N, Cin + F, L)  ==  cat([x, tanh(conv_f(x)) * sigmoid(conv_g(x))], dim=1)
    """
    n, cin, length = x_ncl.shape
    filters = wf.shape[0]
    d = int(dilation)

    tile_l = _pick_tile_l(length, cin, cin + filters, max_tile_l)
    if not (0 < d < tile_l):
        raise ValueError(f"dilation {d} must be in (0, tile_l={tile_l})")
    n_tiles = length // tile_l
    hd = _pick_halo(tile_l, d, n_tiles)
    r = tile_l // hd                       # halo blocks per L tile (static)

    x = x_ncl.astype(jnp.float32)

    # Conv taps -> matmul weights: tap 0 hits x[t-d], tap 1 hits x[t].
    # Filter rows stacked over gate rows; F padded to a sublane multiple.
    f_pad = _round_up(filters, 8)

    def _pad_rows(m):  # (F, Cin) -> (Fp, Cin)
        return jnp.pad(m, ((0, f_pad - filters), (0, 0)))

    w0 = jnp.concatenate([_pad_rows(wf[:, :, 0]), _pad_rows(wg[:, :, 0])],
                         axis=0).astype(jnp.float32)              # (2Fp, Cin)
    w1 = jnp.concatenate([_pad_rows(wf[:, :, 1]), _pad_rows(wg[:, :, 1])],
                         axis=0).astype(jnp.float32)              # (2Fp, Cin)
    b = jnp.concatenate([jnp.pad(bf, (0, f_pad - filters)),
                         jnp.pad(bg, (0, f_pad - filters))]
                        ).reshape(2 * f_pad, 1).astype(jnp.float32)

    kernel = functools.partial(_dense_block_kernel, d=d)

    out = pl.pallas_call(
        kernel,
        out_shape=jax.ShapeDtypeStruct((n, cin + filters, length), jnp.float32),
        grid_spec=pltpu.PrefetchScalarGridSpec(
            num_scalar_prefetch=0,
            grid=(n, n_tiles),
            in_specs=[
                # current L tile
                pl.BlockSpec((1, cin, tile_l), lambda i, j: (i, 0, j)),
                # halo: last hd lanes of the previous L tile (same array x);
                # for j == 0 it points at tile 0 and is masked in the kernel.
                pl.BlockSpec((1, cin, hd),
                             lambda i, j: (i, 0, jnp.maximum(j * r - 1, 0))),
                pl.BlockSpec((2 * f_pad, cin), lambda i, j: (0, 0)),
                pl.BlockSpec((2 * f_pad, cin), lambda i, j: (0, 0)),
                pl.BlockSpec((2 * f_pad, 1), lambda i, j: (0, 0)),
            ],
            out_specs=pl.BlockSpec((1, cin + filters, tile_l),
                                   lambda i, j: (i, 0, j)),
        ),
        compiler_params=pltpu.CompilerParams(
            dimension_semantics=("parallel", "parallel"),
            vmem_limit_bytes=32 * 1024 * 1024,
        ),
    )(x, x, w0, w1, b)

    return out.astype(x_ncl.dtype)


def dense_block_ref(x_ncl, wf, bf, wg, bg, dilation):
    """Pure-JAX reference mirroring the PyTorch semantics."""
    n, cin, length = x_ncl.shape
    d = dilation
    x = jnp.transpose(x_ncl, (0, 2, 1))                               # (N, L, Cin)
    xs = jnp.pad(x, ((0, 0), (d, 0), (0, 0)))[:, :length, :]
    xf = jnp.einsum("nlc,fc->nlf", xs, wf[:, :, 0]) + \
         jnp.einsum("nlc,fc->nlf", x, wf[:, :, 1]) + bf
    xg = jnp.einsum("nlc,fc->nlf", xs, wg[:, :, 0]) + \
         jnp.einsum("nlc,fc->nlf", x, wg[:, :, 1]) + bg
    act = jnp.tanh(xf) * jax.nn.sigmoid(xg)
    out = jnp.concatenate([x, act], axis=-1)
    return jnp.transpose(out, (0, 2, 1))


if __name__ == "__main__":
    # small shapes: batch=2, in_channels=4, seq len=16, filters=8, dilation=2
    N, CIN, L = 2, 4, 16
    FILTERS, K, DILATION = 8, 2, 2

    key = jax.random.PRNGKey(0)
    kx, kwf, kbf, kwg, kbg, kx2 = jax.random.split(key, 6)

    x = jax.random.normal(kx, (N, CIN, L), dtype=jnp.float32)
    wf = jax.random.normal(kwf, (FILTERS, CIN, K), dtype=jnp.float32) * 0.1
    bf = jax.random.normal(kbf, (FILTERS,), dtype=jnp.float32) * 0.1
    wg = jax.random.normal(kwg, (FILTERS, CIN, K), dtype=jnp.float32) * 0.1
    bg = jax.random.normal(kbg, (FILTERS,), dtype=jnp.float32) * 0.1

    out = jax.block_until_ready(dense_block(x, wf, bf, wg, bg, DILATION))
    ref = dense_block_ref(x, wf, bf, wg, bg, DILATION)
    assert out.shape == (N, CIN + FILTERS, L), out.shape
    assert jnp.allclose(out, ref, atol=1e-5, rtol=1e-5)

    # Also exercise the L-tiled path (two 128-wide tiles, halo carries the
    # causal state across the tile boundary; both grid axes parallel).
    L2 = 256
    x2 = jax.random.normal(kx2, (N, CIN, L2), dtype=jnp.float32)
    out2 = jax.block_until_ready(
        dense_block(x2, wf, bf, wg, bg, DILATION, max_tile_l=128))
    ref2 = dense_block_ref(x2, wf, bf, wg, bg, DILATION)
    assert out2.shape == (N, CIN + FILTERS, L2), out2.shape
    assert jnp.allclose(out2, ref2, atol=1e-5, rtol=1e-5)

    print("KERNEL_OK")
</pallas_src>

<mosaic_0001>
module attributes {stable_mosaic.version = 11 : i64} {
  func.func @_dense_block_kernel(%arg0: i32, %arg1: i32, %arg2: memref<1x4x16xf32, #tpu.memory_space<vmem>>, %arg3: memref<1x4x16xf32, #tpu.memory_space<vmem>>, %arg4: memref<16x4xf32, #tpu.memory_space<vmem>>, %arg5: memref<16x4xf32, #tpu.memory_space<vmem>>, %arg6: memref<16x1xf32, #tpu.memory_space<vmem>>, %arg7: memref<1x12x16xf32, #tpu.memory_space<vmem>>) attributes {dimension_semantics = [#tpu.dimension_semantics<parallel>, #tpu.dimension_semantics<parallel>], iteration_bounds = array<i64: 2, 1>, scalar_prefetch = 0 : i64, scratch_operands = 0 : i64, tpu.core_type = #tpu.core_type<tc>, window_params = [{transform_indices = @transform_0, window_bounds = array<i64: 1, 4, 16>}, {transform_indices = @transform_1, window_bounds = array<i64: 1, 4, 16>}, {pipeline_mode = #tpu.pipeline_mode<synchronous>, transform_indices = @transform_2, window_bounds = array<i64: 16, 4>}, {pipeline_mode = #tpu.pipeline_mode<synchronous>, transform_indices = @transform_3, window_bounds = array<i64: 16, 4>}, {pipeline_mode = #tpu.pipeline_mode<synchronous>, transform_indices = @transform_4, window_bounds = array<i64: 16, 1>}, {transform_indices = @transform_5, window_bounds = array<i64: 1, 12, 16>}]} {
    %c0 = arith.constant 0 : index
    %c0_0 = arith.constant 0 : index
    %c0_1 = arith.constant 0 : index
    %0 = vector.load %arg2[%c0, %c0_0, %c0_1] : memref<1x4x16xf32, #tpu.memory_space<vmem>>, vector<1x4x16xf32>
    %1 = vector.shape_cast %0 : vector<1x4x16xf32> to vector<4x16xf32>
    %c0_2 = arith.constant 0 : index
    %c0_3 = arith.constant 0 : index
    %c0_4 = arith.constant 0 : index
    %2 = vector.load %arg3[%c0_2, %c0_3, %c0_4] : memref<1x4x16xf32, #tpu.memory_space<vmem>>, vector<1x4x16xf32>
    %3 = vector.shape_cast %2 : vector<1x4x16xf32> to vector<4x16xf32>
    %4 = vector.extract_strided_slice %3 {offsets = [0, 14], sizes = [4, 2], strides = [1, 1]} : vector<4x16xf32> to vector<4x2xf32>
    %c0_i32 = arith.constant 0 : i32
    %5 = arith.cmpi sgt, %arg1, %c0_i32 : i32
    %cst = arith.constant 0.000000e+00 : f32
    %6 = vector.broadcast %cst : f32 to vector<4x2xf32>
    %7 = arith.select %5, %4, %6 : vector<4x2xf32>
    %8 = vector.extract_strided_slice %1 {offsets = [0, 0], sizes = [4, 14], strides = [1, 1]} : vector<4x16xf32> to vector<4x14xf32>
    %9 = tpu.concatenate %7, %8 in 1 : vector<4x2xf32>, vector<4x14xf32> -> vector<4x16xf32>
    %c0_5 = arith.constant 0 : index
    %c0_6 = arith.constant 0 : index
    %10 = vector.load %arg4[%c0_5, %c0_6] : memref<16x4xf32, #tpu.memory_space<vmem>>, vector<16x4xf32>
    %cst_7 = arith.constant dense<0.000000e+00> : vector<16x16xf32>
    %11 = tpu.matmul %10, %9, %cst_7 {dimension_numbers = #tpu.dot_dimension_numbers<[1], [0], [0], [1], [0, 0, 1, 1], [], []>} : vector<16x4xf32>, vector<4x16xf32>, vector<16x16xf32> -> vector<16x16xf32>
    %c0_8 = arith.constant 0 : index
    %c0_9 = arith.constant 0 : index
    %12 = vector.load %arg5[%c0_8, %c0_9] : memref<16x4xf32, #tpu.memory_space<vmem>>, vector<16x4xf32>
    %cst_10 = arith.constant dense<0.000000e+00> : vector<16x16xf32>
    %13 = tpu.matmul %12, %1, %cst_10 {dimension_numbers = #tpu.dot_dimension_numbers<[1], [0], [0], [1], [0, 0, 1, 1], [], []>} : vector<16x4xf32>, vector<4x16xf32>, vector<16x16xf32> -> vector<16x16xf32>
    %14 = arith.addf %11, %13 : vector<16x16xf32>
    %c0_11 = arith.constant 0 : index
    %c0_12 = arith.constant 0 : index
    %15 = vector.load %arg6[%c0_11, %c0_12] : memref<16x1xf32, #tpu.memory_space<vmem>>, vector<16x1xf32>
    %16 = vector.broadcast %15 : vector<16x1xf32> to vector<16x16xf32>
    %17 = arith.addf %14, %16 : vector<16x16xf32>
    %18 = vector.extract_strided_slice %17 {offsets = [0, 0], sizes = [8, 16], strides = [1, 1]} : vector<16x16xf32> to vector<8x16xf32>
    %19 = vector.extract_strided_slice %17 {offsets = [8, 0], sizes = [8, 16], strides = [1, 1]} : vector<16x16xf32> to vector<8x16xf32>
    %20 = math.tanh %18 : vector<8x16xf32>
    %cst_13 = arith.constant 5.000000e-01 : f32
    %21 = vector.broadcast %cst_13 : f32 to vector<8x16xf32>
    %22 = arith.mulf %21, %19 : vector<8x16xf32>
    %23 = math.tanh %22 : vector<8x16xf32>
    %cst_14 = arith.constant 5.000000e-01 : f32
    %24 = vector.broadcast %cst_14 : f32 to vector<8x16xf32>
    %25 = arith.mulf %24, %23 : vector<8x16xf32>
    %cst_15 = arith.constant 5.000000e-01 : f32
    %26 = vector.broadcast %cst_15 : f32 to vector<8x16xf32>
    %27 = arith.addf %26, %25 : vector<8x16xf32>
    %28 = arith.mulf %20, %27 : vector<8x16xf32>
    %c0_16 = arith.constant 0 : index
    %c0_17 = arith.constant 0 : index
    %c0_18 = arith.constant 0 : index
    %29 = vector.load %arg7[%c0_16, %c0_17, %c0_18] : memref<1x12x16xf32, #tpu.memory_space<vmem>>, vector<1x4x16xf32>
    %30 = vector.shape_cast %29 : vector<1x4x16xf32> to vector<4x16xf32>
    %31 = vector.shape_cast %1 : vector<4x16xf32> to vector<1x4x16xf32>
    tpu.vector_store %arg7[%c0_16, %c0_17, %c0_18], %31 {strides = array<i32>} : memref<1x12x16xf32, #tpu.memory_space<vmem>>, vector<1x4x16xf32>,
    %c0_19 = arith.constant 0 : index
    %c4 = arith.constant 4 : index
    %c0_20 = arith.constant 0 : index
    %32 = vector.load %arg7[%c0_19, %c4, %c0_20] : memref<1x12x16xf32, #tpu.memory_space<vmem>>, vector<1x8x16xf32>
    %33 = vector.shape_cast %32 : vector<1x8x16xf32> to vector<8x16xf32>
    %34 = vector.shape_cast %28 : vector<8x16xf32> to vector<1x8x16xf32>
    tpu.vector_store %arg7[%c0_19, %c4, %c0_20], %34 {strides = array<i32>} : memref<1x12x16xf32, #tpu.memory_space<vmem>>, vector<1x8x16xf32>,
    return
  }
  func.func @transform_0(%arg0: i32, %arg1: i32) -> (i32, i32, i32) {
    %c0_i32 = arith.constant 0 : i32
    %c0_i32_0 = arith.constant 0 : i32
    return %arg0, %c0_i32, %arg1 : i32, i32, i32
  }
  func.func @transform_1(%arg0: i32, %arg1: i32) -> (i32, i32, i32) {
    %c1_i32 = arith.constant 1 : i32
    %0 = arith.muli %arg1, %c1_i32 : i32
    %c1_i32_0 = arith.constant 1 : i32
    %1 = arith.subi %0, %c1_i32_0 : i32
    %c0_i32 = arith.constant 0 : i32
    %2 = arith.maxsi %1, %c0_i32 : i32
    %c0_i32_1 = arith.constant 0 : i32
    %c0_i32_2 = arith.constant 0 : i32
    return %arg0, %c0_i32_1, %2 : i32, i32, i32
  }
  func.func @transform_2(%arg0: i32, %arg1: i32) -> (i32, i32) {
    %c0_i32 = arith.constant 0 : i32
    %c0_i32_0 = arith.constant 0 : i32
    %c0_i32_1 = arith.constant 0 : i32
    return %c0_i32, %c0_i32_0 : i32, i32
  }
  func.func @transform_3(%arg0: i32, %arg1: i32) -> (i32, i32) {
    %c0_i32 = arith.constant 0 : i32
    %c0_i32_0 = arith.constant 0 : i32
    %c0_i32_1 = arith.constant 0 : i32
    return %c0_i32, %c0_i32_0 : i32, i32
  }
  func.func @transform_4(%arg0: i32, %arg1: i32) -> (i32, i32) {
    %c0_i32 = arith.constant 0 : i32
    %c0_i32_0 = arith.constant 0 : i32
    %c0_i32_1 = arith.constant 0 : i32
    return %c0_i32, %c0_i32_0 : i32, i32
  }
  func.func @transform_5(%arg0: i32, %arg1: i32) -> (i32, i32, i32) {
    %c0_i32 = arith.constant 0 : i32
    %c0_i32_0 = arith.constant 0 : i32
    return %arg0, %c0_i32, %arg1 : i32, i32, i32
  }
}

</mosaic_0001>

<bundles_post_ra>
// kernel: tpu_custom_call.1
= control target key start
LH: loop header
LB: loop body
LE: loop exit
PB: predicated region body
PF: predicated region fallthrough
CT: control target
= control target key end

     0   :  { %s739_s18 = smov 0   ;;  %s741_s19 = smov 0   ;;  %s802_s0 = inlined_call_operand.vmem [shape: f32[2,4,16], index: 0, kind: input, shape index: {}]   ;;  %s803_s1 = inlined_call_operand.vmem [shape: f32[2,4,16], index: 1, kind: input, shape index: {}]   ;;  %s804_s2 = inlined_call_operand.vmem [shape: f32[16,4], index: 2, kind: input, shape index: {}]   ;;  %s805_s3 = inlined_call_operand.vmem [shape: f32[16,4], index: 3, kind: input, shape index: {}]   ;;  %s806_s4 = inlined_call_operand.vmem [shape: f32[16,1], index: 4, kind: input, shape index: {}]   ;;  %s807_s5 = inlined_call_operand.vmem [shape: f32[2,12,16], index: 5, kind: output, shape index: {}]  }
   0x1   :  { %s743_s20 = smov 0  }
   0x2 LB: > { %s27_s1 = sadd.s32 1, %s699_s19  ;;  %p615_p0 = scmp.ge.s32.totalorder %s703_s20, 1  ;;  %s703_s20 = sphi %s743_s20, %s15_s20   ;;  %s699_s19 = sphi %s741_s19, %s809_s19   ;;  %s695_s18 = sphi %s739_s18, %s808_s18  }
   0x3   : > { %p29_p1 = scmp.ge.s32.totalorder %s27_s1, 2  ;;  %p231_p2 = scmp.lt.s32.totalorder %s703_s20, 3 }
   0x5   : > { %s811_s1 = smov (%p29_p1, %s27_s1), 0  ;;  %p232_p3 = pnand %p615_p0, %p231_p2 }
   0x6   : > { %p274_p4 = scmp.lt.s32.totalorder (!%p232_p3), %s695_s18, 1  ;;  %v321_v0 = vld [vmem:[%s805_s3] sm:$0xff] (!%p232_p3)  ;;  %v705_v1 = vmov (!%p232_p3), 0.0   ;;  %s706_s23 = smov (!%p232_p3), 114   ;;  %vm323_vm0 = vcmask (!%p232_p3), 31744   ;;  %v493_v3 = vld [vmem:[%s806_s4 + $0x8] sm:$0xff] (!%p232_p3) }
   0x7   : > { %235 = sbr.rel (%p232_p3) target bundleno = 372 (0x174), region = 40  ;;  %310 = vrot.lane.b32.xlu0 (!%p232_p3), %v705_v1, %s706_s23  ;;  %v319_v2 = vld [vmem:[%s804_s2] sm:$0xff] (!%p232_p3)  ;;  %637 = vmatprep.mubr.msk.f32.mxu1 (!%p232_p3), %vm323_vm0, %v321_v0  ;;  %v707_v4 = vmov (!%p232_p3), 0   ;;  %vm512_vm1 = vcmask (!%p232_p3), 125952   ;;  %vm330_vm2 = vcmask (!%p232_p3), 1043456   ;;  %v322_v7 = vld [vmem:[%s805_s3 + $0x8] sm:$0xff] (!%p232_p3) }
   0x8   : > { %642 = vmatprep.mubr.msk.f32.mxu0 (!%p232_p3), %vm323_vm0, %v319_v2  ;;  %675 = vset.pattern.permute.xlu1 (!%p232_p3), %v707_v4  ;;  %v492_v5 = vld [vmem:[%s806_s4] sm:$0xff] (!%p232_p3)  ;;  %s708_s15 = smov (!%p232_p3), 2   ;;  %vm317_vm3 = vcmask (!%p232_p3), 15360   ;;  %v320_v11 = vld [vmem:[%s804_s2 + $0x8] sm:$0xff] (!%p232_p3)  ;;  %vm514_vm4 = vcmask (!%p232_p3), 130048  }
   0x9   : > { %676 = vset.pattern.permute.xlu0 (!%p232_p3), %v707_v4  ;;  %501 = vperm.xlu1 (!%p232_p3), %675, %v493_v3  }
   0xd   : > { %496 = vperm.xlu1 (!%p232_p3), %675, %v492_v5  }
   0xe   : > { %s813_s18 = smov (!%p274_p4, %s695_s18), 1 }
   0xf   : > { %s616_s28 = sshll.u32 %s813_s18, 2  ;;  %s628_s29 = sshll.u32 %s813_s18, 4 }
  0x10   : > { %s280_s7 = scalar_lea.vmem %s802_s0, %s616_s28  ;;  %s774_s10 = scalar_lea.vmem %s807_s5, %s628_s29 }
  0x11   : > { %v302_v6 = vld [vmem:[%s280_s7] sm:$0xf] }
  0x12   : > { %314 = vrot.lane.b32.xlu0 %v302_v6, %s708_s15  ;;  %513 = vst.msk [vmem:[%s774_s10] sm:$0xf] %vm512_vm1, %v302_v6  ;;  %635 = vmatprep.subr.msk.mxu1 %vm330_vm2, %v302_v6 }
  0x13   : > { %636 = vmatpush3.msk.msra.mxu1 %vm330_vm2, %v302_v6 }
  0x14   : > { %638 = vmatmul.mubr.msk.f32.vlgmr.msra.gmra.mrb[0].mxu1 %vm323_vm0, %v322_v7 }
  0x79   : > { %v311_v8 = vpop.permute.xlu0 %310 }
  0x84   : > { %v315_v9 = vpop.permute.xlu0 %314 }
  0x85   : > { %v318_v10 = vsel %vm317_vm3, %v311_v8, %v315_v9 }
  0x86   : > { %640 = vmatprep.subr.msk.mxu0 %vm330_vm2, %v318_v10 }
  0x87   : > { %641 = vmatpush3.msk.msra.mxu0 %vm330_vm2, %v318_v10 }
  0x88   : > { %643 = vmatmul.mubr.msk.f32.vlgmr.msra.gmra.mrb[0].mxu0 %vm323_vm0, %v320_v11  ;;  %v502_v14 = vpop.permute.xlu1 %501 }
  0x8c   : > { %v497_v20 = vpop.permute.xlu1 %496 }
  0xe7   : > { %v639_v12 = vpop.f32.mrb[0].mxu1 }
  0xe8   : > { %v399_v13 = vpop.f32.mrb[1].mxu1 }
 0x15b   : > { %v644_v15 = vpop.f32.mrb[0].mxu0 }
 0x15c   : > { %v489_v16 = vadd.f32 %v644_v15, %v639_v12  ;;  %v483_v17 = vpop.f32.mrb[1].mxu0 }
 0x15d   : > { %v484_v18 = vadd.f32 %v483_v17, %v399_v13 }
 0x15e   : > { %v505_v19 = vadd.f32 %v502_v14, %v489_v16 }
 0x15f   : > { %v504_v22 = vadd.f32 %v497_v20, %v484_v18 }
 0x160   : > { %v507_v21 = vmul.f32 0.5, %v505_v19 }
 0x162   : > { %677 = vtanh.f32 %v507_v21 }
 0x163   : > { %679 = vtanh.f32 %v504_v22 }
 0x16c   : > { %v678_v23 = vpop.eup %677 }
 0x16d   : > { %v509_v24 = vmul.f32 0.5, %v678_v23  ;;  %v680_v26 = vpop.eup %679 }
 0x16f   : > { %v510_v25 = vadd.f32 0.5, %v509_v24 }
 0x171   : > { %v511_v27 = vmul.f32 %v680_v26, %v510_v25 }
 0x173   : > { %515 = vst.msk [vmem:[%s774_s10 + $0x4] sm:$0xff] %vm514_vm4, %v511_v27 }
 0x174 PF: > { %s15_s20 = sadd.s32 1, %s703_s20   ;;  %s808_s18 = smov %s699_s19 }
 0x175   : > { %p12_p5 = scmp.ge.s32.totalorder %s15_s20, 4   ;;  %s809_s19 = smov %s811_s1 }
 0x177   :  { %14 = sbr.rel (!%p12_p5) target bundleno = 2 (0x2), region = 73 }

</bundles_post_ra>
